<compile_context>
chip_gen: v5e
topology: v5e:2x2
jax: 0.10.0
libtpu: 0.0.40
codegen_flags: <defaults>
</compile_context>

<pallas_src>
import functools

import jax
import jax.numpy as jnp
from jax.experimental import pallas as pl
from jax.experimental.pallas import tpu as pltpu

LANE = 128
SUBLANE = 8


def _round_up(x, m):
    return ((x + m - 1) // m) * m


# ----------------------------------------------------------------------------
# Fused MLP kernel: for one row-tile of x, run all layers back-to-back.
# refs = (x_ref, w0, b0, w1, b1, ..., w_{L-1}, b_{L-1}, o_ref)
# ----------------------------------------------------------------------------
def _mlp_kernel(*refs, num_layers):
    x_ref = refs[0]
    o_ref = refs[-1]
    wb = refs[1:-1]

    h = x_ref[...].astype(jnp.bfloat16)              # (TILE_N, F) f32 -> bf16 in-register
    for i in range(num_layers):
        w = wb[2 * i][...]                           # bf16 (Kin, Kout)
        b = wb[2 * i + 1][...]                       # f32  (1, Kout)
        y = jnp.dot(h, w, preferred_element_type=jnp.float32) + b   # MXU, f32 acc
        if i != num_layers - 1:
            h = jnp.maximum(y, 0.0).astype(jnp.bfloat16)             # relu, back to bf16
        else:
            o_ref[...] = y.astype(o_ref.dtype)       # (TILE_N, num_class) store


def _pick_tile_n(n, max_tile=1024):
    """Multiple of 8; >= 2 grid steps when possible (v7x dual-TC); capped for VMEM."""
    n_sub = _round_up(n, SUBLANE)
    if n_sub <= SUBLANE:
        return SUBLANE
    half = _round_up((n_sub + 1) // 2, SUBLANE)
    return min(max_tile, half)


def mlp_pallas(x, padded_params, num_class, *, max_tile_n=1024):
    """x: (N, F) f32 (natural layout, no padding).

    padded_params: [(W bf16, b f32 (1, D)), ...] where the first layer keeps K = F,
    the last layer keeps N = num_class, and all hidden dims are padded to 128 lanes.
    Returns (N, num_class) f32 logits.
    """
    num_layers = len(padded_params)
    n, f = x.shape

    tile_n = _pick_tile_n(n, max_tile_n)
    grid = (pl.cdiv(n, tile_n),)

    in_specs = [pl.BlockSpec((tile_n, f), lambda i: (i, 0))]
    args = [x]
    for (w, b) in padded_params:
        in_specs.append(pl.BlockSpec(w.shape, lambda i: (0, 0)))   # VMEM-resident
        in_specs.append(pl.BlockSpec(b.shape, lambda i: (0, 0)))
        args.extend([w, b])

    flops = 2 * n * sum(int(w.shape[0]) * int(w.shape[1]) for w, _ in padded_params)
    bytes_accessed = (
        n * f * 4 + n * num_class * 4
        + sum(w.size * 2 + b.size * 4 for w, b in padded_params)
    )

    out = pl.pallas_call(
        functools.partial(_mlp_kernel, num_layers=num_layers),
        out_shape=jax.ShapeDtypeStruct((n, num_class), jnp.float32),
        grid_spec=pl.GridSpec(
            grid=grid,
            in_specs=in_specs,
            out_specs=pl.BlockSpec((tile_n, num_class), lambda i: (i, 0)),
        ),
        compiler_params=pltpu.CompilerParams(
            dimension_semantics=("parallel",)),
        cost_estimate=pl.CostEstimate(
            flops=int(flops), transcendentals=0, bytes_accessed=int(bytes_accessed)),
    )(*args)

    return out


# ----------------------------------------------------------------------------
# Parameter construction (deterministic, mimics nn.Linear / BatchNorm1d init)
# ----------------------------------------------------------------------------
def init_linear(key, fan_in, fan_out):
    # PyTorch Linear.reset_parameters: kaiming_uniform(a=sqrt(5)) on weight,
    # uniform(-1/sqrt(fan_in), 1/sqrt(fan_in)) on bias.
    kw, kb = jax.random.split(key)
    bound_w = jnp.sqrt(6.0 / fan_in) / jnp.sqrt(1.0 + 5.0)
    w = jax.random.uniform(kw, (fan_in, fan_out), jnp.float32, -bound_w, bound_w)
    bound_b = 1.0 / jnp.sqrt(fan_in)
    b = jax.random.uniform(kb, (fan_out,), jnp.float32, -bound_b, bound_b)
    return w, b


def init_bn(dim, eps=1e-5):
    # BatchNorm1d init: gamma=1, beta=0, running_mean=0, running_var=1 (eval mode).
    gamma = jnp.ones((dim,), jnp.float32)
    beta = jnp.zeros((dim,), jnp.float32)
    running_mean = jnp.zeros((dim,), jnp.float32)
    running_var = jnp.ones((dim,), jnp.float32)
    scale = gamma / jnp.sqrt(running_var + eps)
    shift = beta - running_mean * scale
    return scale, shift


def build_params(key, num_feat, hidden_dim, num_class, num_layers):
    keys = jax.random.split(key, max(num_layers, 1))
    layers, bns = [], []
    if num_layers == 1:
        layers.append(init_linear(keys[0], num_feat, num_class))
    else:
        layers.append(init_linear(keys[0], num_feat, hidden_dim))
        bns.append(init_bn(hidden_dim))
        for li in range(num_layers - 2):
            layers.append(init_linear(keys[1 + li], hidden_dim, hidden_dim))
            bns.append(init_bn(hidden_dim))
        layers.append(init_linear(keys[-1], hidden_dim, num_class))
    return layers, bns


def fold_and_pad(layers, bns, *, with_bn=True):
    """Fold eval-mode BN into each Linear, pad hidden dims to 128 lanes, cast W to bf16.

    The first layer keeps K = num_feat (so x needs no lane padding) and the last layer
    keeps N = num_class (so the output needs no column slicing).  Returns
    (folded_f32, padded) where folded_f32 keeps un-padded f32 params for the reference
    check and padded is [(W bf16, b f32 (1, D)), ...] for the kernel.
    """
    num_layers = len(layers)
    folded_f32 = []
    for i, (w, b) in enumerate(layers):
        if with_bn and i != num_layers - 1:
            scale, shift = bns[i]
            w = w * scale[None, :]
            b = b * scale + shift
        folded_f32.append((w, b))

    padded = []
    for i, (w, b) in enumerate(folded_f32):
        din, dout = w.shape
        dpi = din if i == 0 else _round_up(din, LANE)               # natural K for layer 0
        dpo = dout if i == num_layers - 1 else _round_up(dout, LANE)  # natural N for last layer
        w_p = jnp.zeros((dpi, dpo), jnp.float32).at[:din, :dout].set(w).astype(jnp.bfloat16)
        b_p = jnp.zeros((1, dpo), jnp.float32).at[0, :dout].set(b)
        padded.append((w_p, b_p))
    return folded_f32, padded


if __name__ == "__main__":
    # Small, deterministic config: 64 nodes, 16 features, hidden 32, 8 classes, 3 layers.
    num_nodes, num_feat, hidden_dim, num_class, num_layers = 64, 16, 32, 8, 3
    with_bn = True
    # TODO(synk): dropout is identity in eval mode (training=False) and BN uses running
    # stats; this kernel must not be reused for training without PRNG masking / live stats.

    key = jax.random.PRNGKey(0)
    kx, kp = jax.random.split(key)
    x = jax.random.normal(kx, (num_nodes, num_feat), jnp.float32)

    layers, bns = build_params(kp, num_feat, hidden_dim, num_class, num_layers)
    folded_f32, padded = fold_and_pad(layers, bns, with_bn=with_bn)

    out = mlp_pallas(x, padded, num_class)
    out = jax.block_until_ready(out)

    # Reference in plain JAX, applying the same bf16 rounding / f32 accumulation.
    ref = x
    for i, (w, b) in enumerate(folded_f32):
        y = jnp.dot(ref.astype(jnp.bfloat16), w.astype(jnp.bfloat16),
                    preferred_element_type=jnp.float32) + b
        if i != num_layers - 1:
            ref = jnp.maximum(y, 0.0)
        else:
            ref = y

    assert out.shape == (num_nodes, num_class)
    assert jnp.allclose(out, ref, atol=1e-2, rtol=1e-2), float(jnp.max(jnp.abs(out - ref)))

    print("KERNEL_OK")
</pallas_src>

<mosaic_0001>
module attributes {stable_mosaic.version = 11 : i64} {
  func.func @_mlp_kernel(%arg0: i32, %arg1: memref<32x16xf32, #tpu.memory_space<vmem>>, %arg2: memref<16x128xbf16, #tpu.memory_space<vmem>>, %arg3: memref<1x128xf32, #tpu.memory_space<vmem>>, %arg4: memref<128x128xbf16, #tpu.memory_space<vmem>>, %arg5: memref<1x128xf32, #tpu.memory_space<vmem>>, %arg6: memref<128x8xbf16, #tpu.memory_space<vmem>>, %arg7: memref<1x8xf32, #tpu.memory_space<vmem>>, %arg8: memref<32x8xf32, #tpu.memory_space<vmem>>) attributes {dimension_semantics = [#tpu.dimension_semantics<parallel>], iteration_bounds = array<i64: 2>, scalar_prefetch = 0 : i64, scratch_operands = 0 : i64, tpu.core_type = #tpu.core_type<tc>, window_params = [{transform_indices = @transform_0, window_bounds = array<i64: 32, 16>}, {pipeline_mode = #tpu.pipeline_mode<synchronous>, transform_indices = @transform_1, window_bounds = array<i64: 16, 128>}, {pipeline_mode = #tpu.pipeline_mode<synchronous>, transform_indices = @transform_2, window_bounds = array<i64: 1, 128>}, {pipeline_mode = #tpu.pipeline_mode<synchronous>, transform_indices = @transform_3, window_bounds = array<i64: 128, 128>}, {pipeline_mode = #tpu.pipeline_mode<synchronous>, transform_indices = @transform_4, window_bounds = array<i64: 1, 128>}, {pipeline_mode = #tpu.pipeline_mode<synchronous>, transform_indices = @transform_5, window_bounds = array<i64: 128, 8>}, {pipeline_mode = #tpu.pipeline_mode<synchronous>, transform_indices = @transform_6, window_bounds = array<i64: 1, 8>}, {transform_indices = @transform_7, window_bounds = array<i64: 32, 8>}]} {
    %c0 = arith.constant 0 : index
    %c0_0 = arith.constant 0 : index
    %0 = vector.load %arg1[%c0, %c0_0] : memref<32x16xf32, #tpu.memory_space<vmem>>, vector<32x16xf32>
    %1 = arith.truncf %0 : vector<32x16xf32> to vector<32x16xbf16>
    %c0_1 = arith.constant 0 : index
    %c0_2 = arith.constant 0 : index
    %2 = vector.load %arg2[%c0_1, %c0_2] : memref<16x128xbf16, #tpu.memory_space<vmem>>, vector<16x128xbf16>
    %c0_3 = arith.constant 0 : index
    %c0_4 = arith.constant 0 : index
    %3 = vector.load %arg3[%c0_3, %c0_4] : memref<1x128xf32, #tpu.memory_space<vmem>>, vector<1x128xf32>
    %cst = arith.constant dense<0.000000e+00> : vector<32x128xf32>
    %4 = tpu.matmul %1, %2, %cst {dimension_numbers = #tpu.dot_dimension_numbers<[1], [0], [0], [1], [0, 0, 1, 1], [], []>} : vector<32x16xbf16>, vector<16x128xbf16>, vector<32x128xf32> -> vector<32x128xf32>
    %5 = vector.broadcast %3 : vector<1x128xf32> to vector<32x128xf32>
    %6 = arith.addf %4, %5 : vector<32x128xf32>
    %cst_5 = arith.constant 0.000000e+00 : f32
    %7 = vector.broadcast %cst_5 : f32 to vector<32x128xf32>
    %8 = arith.maximumf %6, %7 : vector<32x128xf32>
    %9 = arith.truncf %8 : vector<32x128xf32> to vector<32x128xbf16>
    %c0_6 = arith.constant 0 : index
    %c0_7 = arith.constant 0 : index
    %10 = vector.load %arg4[%c0_6, %c0_7] : memref<128x128xbf16, #tpu.memory_space<vmem>>, vector<128x128xbf16>
    %c0_8 = arith.constant 0 : index
    %c0_9 = arith.constant 0 : index
    %11 = vector.load %arg5[%c0_8, %c0_9] : memref<1x128xf32, #tpu.memory_space<vmem>>, vector<1x128xf32>
    %cst_10 = arith.constant dense<0.000000e+00> : vector<32x128xf32>
    %12 = tpu.matmul %9, %10, %cst_10 {dimension_numbers = #tpu.dot_dimension_numbers<[1], [0], [0], [1], [0, 0, 1, 1], [], []>} : vector<32x128xbf16>, vector<128x128xbf16>, vector<32x128xf32> -> vector<32x128xf32>
    %13 = vector.broadcast %11 : vector<1x128xf32> to vector<32x128xf32>
    %14 = arith.addf %12, %13 : vector<32x128xf32>
    %cst_11 = arith.constant 0.000000e+00 : f32
    %15 = vector.broadcast %cst_11 : f32 to vector<32x128xf32>
    %16 = arith.maximumf %14, %15 : vector<32x128xf32>
    %17 = arith.truncf %16 : vector<32x128xf32> to vector<32x128xbf16>
    %c0_12 = arith.constant 0 : index
    %c0_13 = arith.constant 0 : index
    %18 = vector.load %arg6[%c0_12, %c0_13] : memref<128x8xbf16, #tpu.memory_space<vmem>>, vector<128x8xbf16>
    %c0_14 = arith.constant 0 : index
    %c0_15 = arith.constant 0 : index
    %19 = vector.load %arg7[%c0_14, %c0_15] : memref<1x8xf32, #tpu.memory_space<vmem>>, vector<1x8xf32>
    %cst_16 = arith.constant dense<0.000000e+00> : vector<32x8xf32>
    %20 = tpu.matmul %17, %18, %cst_16 {dimension_numbers = #tpu.dot_dimension_numbers<[1], [0], [0], [1], [0, 0, 1, 1], [], []>} : vector<32x128xbf16>, vector<128x8xbf16>, vector<32x8xf32> -> vector<32x8xf32>
    %21 = vector.broadcast %19 : vector<1x8xf32> to vector<32x8xf32>
    %22 = arith.addf %20, %21 : vector<32x8xf32>
    %c0_17 = arith.constant 0 : index
    %c0_18 = arith.constant 0 : index
    %23 = vector.load %arg8[%c0_17, %c0_18] : memref<32x8xf32, #tpu.memory_space<vmem>>, vector<32x8xf32>
    tpu.vector_store %arg8[%c0_17, %c0_18], %22 {strides = array<i32>} : memref<32x8xf32, #tpu.memory_space<vmem>>, vector<32x8xf32>,
    return
  }
  func.func @transform_0(%arg0: i32) -> (i32, i32) {
    %c0_i32 = arith.constant 0 : i32
    %c0_i32_0 = arith.constant 0 : i32
    return %arg0, %c0_i32 : i32, i32
  }
  func.func @transform_1(%arg0: i32) -> (i32, i32) {
    %c0_i32 = arith.constant 0 : i32
    %c0_i32_0 = arith.constant 0 : i32
    %c0_i32_1 = arith.constant 0 : i32
    return %c0_i32, %c0_i32_0 : i32, i32
  }
  func.func @transform_2(%arg0: i32) -> (i32, i32) {
    %c0_i32 = arith.constant 0 : i32
    %c0_i32_0 = arith.constant 0 : i32
    %c0_i32_1 = arith.constant 0 : i32
    return %c0_i32, %c0_i32_0 : i32, i32
  }
  func.func @transform_3(%arg0: i32) -> (i32, i32) {
    %c0_i32 = arith.constant 0 : i32
    %c0_i32_0 = arith.constant 0 : i32
    %c0_i32_1 = arith.constant 0 : i32
    return %c0_i32, %c0_i32_0 : i32, i32
  }
  func.func @transform_4(%arg0: i32) -> (i32, i32) {
    %c0_i32 = arith.constant 0 : i32
    %c0_i32_0 = arith.constant 0 : i32
    %c0_i32_1 = arith.constant 0 : i32
    return %c0_i32, %c0_i32_0 : i32, i32
  }
  func.func @transform_5(%arg0: i32) -> (i32, i32) {
    %c0_i32 = arith.constant 0 : i32
    %c0_i32_0 = arith.constant 0 : i32
    %c0_i32_1 = arith.constant 0 : i32
    return %c0_i32, %c0_i32_0 : i32, i32
  }
  func.func @transform_6(%arg0: i32) -> (i32, i32) {
    %c0_i32 = arith.constant 0 : i32
    %c0_i32_0 = arith.constant 0 : i32
    %c0_i32_1 = arith.constant 0 : i32
    return %c0_i32, %c0_i32_0 : i32, i32
  }
  func.func @transform_7(%arg0: i32) -> (i32, i32) {
    %c0_i32 = arith.constant 0 : i32
    %c0_i32_0 = arith.constant 0 : i32
    return %arg0, %c0_i32 : i32, i32
  }
}

</mosaic_0001>

<bundles_post_ra>
// kernel: tpu_custom_call.1
= control target key start
LH: loop header
LB: loop body
LE: loop exit
PB: predicated region body
PF: predicated region fallthrough
CT: control target
= control target key end

     0   :  { %s747_s24 = smov 0   ;;  %s831_s0 = inlined_call_operand.vmem [shape: f32[64,16], index: 0, kind: input, shape index: {}]   ;;  %s832_s1 = inlined_call_operand.vmem [shape: bf16[16,128], index: 1, kind: input, shape index: {}]   ;;  %s833_s2 = inlined_call_operand.vmem [shape: f32[1,128], index: 2, kind: input, shape index: {}]   ;;  %s834_s3 = inlined_call_operand.vmem [shape: bf16[128,128], index: 3, kind: input, shape index: {}]   ;;  %s835_s4 = inlined_call_operand.vmem [shape: f32[1,128], index: 4, kind: input, shape index: {}]   ;;  %s836_s5 = inlined_call_operand.vmem [shape: bf16[128,8], index: 5, kind: input, shape index: {}]   ;;  %s837_s6 = inlined_call_operand.vmem [shape: f32[1,8], index: 6, kind: input, shape index: {}]   ;;  %s838_s7 = inlined_call_operand.vmem [shape: f32[64,8], index: 7, kind: output, shape index: {}]  }
   0x1 LB: > { %s574_s25 = sadd.s32 4294967295, %s705_s24   ;;  %p578_p0 = scmp.ge.s32.totalorder %s705_s24, 1  ;;  %s705_s24 = sphi %s747_s24, %s17_s24  }
   0x2   : > { %p238_p1 = scmp.lt.s32.totalorder %s705_s24, 3 }
   0x4   : > { %p239_p2 = pnand %p578_p0, %p238_p1 }
   0x5   : > { %s579_s28 = sshll.u32 (!%p239_p2), %s574_s25, 2 }
   0x6   : > { %242 = sbr.rel (%p239_p2) target bundleno = 462 (0x1ce), region = 48  ;;  %p271_p3 = scmp.lt.s32.totalorder (!%p239_p2), %s579_s28, 7 }
   0xb   : > { %v655_v0 = vld [vmem:[%s832_s1] sm:$0xff]  ;;  %v663_v1 = vld [vmem:[%s834_s3 + $0x38] sm:$0xff]  ;;  %v662_v2 = vld [vmem:[%s834_s3 + $0x30] sm:$0xff]  ;;  %s840_s28 = smov (!%p271_p3, %s579_s28), 7  ;;  %vm301_vm0 = vcmask 130048   ;;  %vm513_vm1 = vcmask 64512  }
   0xc   : > { %315 = vmatpush.bf16.msra.mxu0 %v655_v0  ;;  %401 = vmatpush.bf16.msra.mxu1 %v663_v1  ;;  %s580_s10 = sshll.u32 %s840_s28, 3  ;;  %v661_v3 = vld [vmem:[%s834_s3 + $0x28] sm:$0xff]  ;;  %v660_v7 = vld [vmem:[%s834_s3 + $0x20] sm:$0xff]  ;;  %v659_v11 = vld [vmem:[%s834_s3 + $0x18] sm:$0xff] }
   0xd   : > { %672 = vmatpush.bf16.msra.mxu3 %v663_v1  ;;  %s274_s13 = scalar_lea.vmem %s831_s0, %s580_s10  ;;  %v658_v12 = vld [vmem:[%s834_s3 + $0x10] sm:$0xff]  ;;  %v657_v13 = vld [vmem:[%s834_s3 + $0x8] sm:$0xff]  ;;  %v656_v14 = vld [vmem:[%s834_s3] sm:$0xff]  ;;  %s280_s9 = scalar_lea.vmem %s838_s7, %s580_s10 }
   0xe   : > { %v283_v4 = vld [vmem:[%s274_s13] sm:$0xff]  ;;  %v284_v5 = vld [vmem:[%s274_s13 + $0x8] sm:$0xff]  ;;  %v285_v8 = vld [vmem:[%s274_s13 + $0x10] sm:$0xff] }
   0xf   : > { %v287_v6 = vpack.c.bf16 %v284_v5, %v283_v4  ;;  %v286_v9 = vld [vmem:[%s274_s13 + $0x18] sm:$0xff]  ;;  %v670_v17 = vld [vmem:[%s836_s5 + $0x30] sm:$0xff]  ;;  %v696_v18 = vld [vmem:[%s833_s2] ss:$0 sm:$0xff] }
  0x10   : > { %402 = vmatpush.bf16.msra.mxu1 %v662_v2  ;;  %v288_v10 = vpack.c.bf16 %v286_v9, %v285_v8  ;;  %v671_v15 = vld [vmem:[%s836_s5 + $0x38] sm:$0xff]  ;;  %v669_v19 = vld [vmem:[%s836_s5 + $0x28] sm:$0xff]  ;;  %v668_v23 = vld [vmem:[%s836_s5 + $0x20] sm:$0xff] }
  0x11   : > { %673 = vmatpush.bf16.msra.mxu3 %v662_v2  ;;  %587 = vmatmul.msk.bf16.vlgmr.msra.gmra.mxu0 %vm301_vm0, %v287_v6  ;;  %v667_v34 = vld [vmem:[%s836_s5 + $0x18] sm:$0xff]  ;;  %v666_v35 = vld [vmem:[%s836_s5 + $0x10] sm:$0xff]  ;;  %v665_v36 = vld [vmem:[%s836_s5 + $0x8] sm:$0xff] }
  0x12   : > { %494 = vmatpush.bf16.msrb.mxu0 %v671_v15  ;;  %680 = vmatpush.bf16.msra.mxu2 %v671_v15  ;;  %v664_v37 = vld [vmem:[%s836_s5] sm:$0xff] }
  0x13   : > { %v697_v39 = vld [vmem:[%s835_s4] ss:$0 sm:$0xff] }
  0x14   : > { %403 = vmatpush.bf16.msra.mxu1 %v661_v3  ;;  %v698_v53 = vld [vmem:[%s837_s6] ss:$0 sm:$0xff] }
  0x15   : > { %674 = vmatpush.bf16.msra.mxu3 %v661_v3 }
  0x16   : > { %495 = vmatpush.bf16.msrb.mxu0 %v670_v17  ;;  %681 = vmatpush.bf16.msra.mxu2 %v670_v17 }
  0x18   : > { %404 = vmatpush.bf16.msra.mxu1 %v660_v7 }
  0x19   : > { %675 = vmatpush.bf16.msra.mxu3 %v660_v7 }
  0x1a   : > { %496 = vmatpush.bf16.msrb.mxu0 %v669_v19  ;;  %682 = vmatpush.bf16.msra.mxu2 %v669_v19 }
  0x1c   : > { %405 = vmatpush.bf16.msra.mxu1 %v659_v11 }
  0x1d   : > { %676 = vmatpush.bf16.msra.mxu3 %v659_v11 }
  0x1e   : > { %497 = vmatpush.bf16.msrb.mxu0 %v668_v23  ;;  %683 = vmatpush.bf16.msra.mxu2 %v668_v23 }
  0x20   : > { %406 = vmatpush.bf16.msra.mxu1 %v658_v12 }
  0x21   : > { %588 = vmatmul.msk.bf16.gmra.mxu0 %vm301_vm0, %v288_v10  ;;  %677 = vmatpush.bf16.msra.mxu3 %v658_v12 }
  0x22   : > { %498 = vmatpush.bf16.msrb.mxu0 %v667_v34  ;;  %684 = vmatpush.bf16.msra.mxu2 %v667_v34 }
  0x24   : > { %407 = vmatpush.bf16.msra.mxu1 %v657_v13 }
  0x25   : > { %678 = vmatpush.bf16.msra.mxu3 %v657_v13 }
  0x26   : > { %499 = vmatpush.bf16.msrb.mxu0 %v666_v35  ;;  %685 = vmatpush.bf16.msra.mxu2 %v666_v35 }
  0x28   : > { %408 = vmatpush.bf16.msra.mxu1 %v656_v14 }
  0x29   : > { %679 = vmatpush.bf16.msra.mxu3 %v656_v14 }
  0x2a   : > { %500 = vmatpush.bf16.msrb.mxu0 %v665_v36  ;;  %686 = vmatpush.bf16.msra.mxu2 %v665_v36 }
  0x2e   : > { %501 = vmatpush.bf16.msrb.mxu0 %v664_v37  ;;  %687 = vmatpush.bf16.msra.mxu2 %v664_v37 }
  0x8e   : > { %v317_v16 = vpop.f32.mrf.mxu0 }
  0x8f   : > { %v318_v20 = vadd.f32 %v696_v18, %v317_v16 }
  0x91   : > { %v327_v24 = vmax.f32 %v318_v20, 0.0 }
  0x96   : > { %v319_v21 = vpop.f32.mrf.mxu0 }
  0x97   : > { %v320_v22 = vadd.f32 %v696_v18, %v319_v21 }
  0x99   : > { %v328_v25 = vmax.f32 %v320_v22, 0.0 }
  0x9b   : > { %v331_v26 = vpack.c.bf16 %v328_v25, %v327_v24 }
  0x9d   : > { %409 = vmatmul.bf16.vlgmr.msra.gmra.mxu1 %v331_v26 }
  0x9e   : > { %v322_v27 = vpop.f32.mrf.mxu0 }
  0x9f   : > { %v323_v28 = vadd.f32 %v696_v18, %v322_v27 }
  0xa1   : > { %v329_v31 = vmax.f32 %v323_v28, 0.0 }
  0xa6   : > { %v324_v29 = vpop.f32.mrf.mxu0 }
  0xa7   : > { %v325_v30 = vadd.f32 %v696_v18, %v324_v29 }
  0xa9   : > { %v330_v32 = vmax.f32 %v325_v30, 0.0 }
  0xab   : > { %v332_v33 = vpack.c.bf16 %v330_v32, %v329_v31 }
  0xad   : > { %414 = vmatmul.bf16.vlgmr.msra.gmra.mxu3 %v332_v33 }
 0x11a   : > { %v410_v38 = vpop.f32.mrf.mxu1 }
 0x11b   : > { %v411_v40 = vadd.f32 %v697_v39, %v410_v38 }
 0x11d   : > { %v420_v43 = vmax.f32 %v411_v40, 0.0 }
 0x122   : > { %v412_v41 = vpop.f32.mrf.mxu1 }
 0x123   : > { %v413_v42 = vadd.f32 %v697_v39, %v412_v41 }
 0x125   : > { %v421_v44 = vmax.f32 %v413_v42, 0.0 }
 0x127   : > { %v424_v45 = vpack.c.bf16 %v421_v44, %v420_v43 }
 0x129   : > { %502 = vmatmul.bf16.vlgmr.msrb.gmra.mxu0 %v424_v45 }
 0x130   : > { %v415_v46 = vpop.f32.mrf.mxu3 }
 0x131   : > { %v416_v47 = vadd.f32 %v697_v39, %v415_v46 }
 0x133   : > { %v422_v50 = vmax.f32 %v416_v47, 0.0 }
 0x138   : > { %v417_v48 = vpop.f32.mrf.mxu3 }
 0x139   : > { %v418_v49 = vadd.f32 %v697_v39, %v417_v48 }
 0x13b   : > { %v423_v51 = vmax.f32 %v418_v49, 0.0 }
 0x13d   : > { %v425_v52 = vpack.c.bf16 %v423_v51, %v422_v50 }
 0x13f   : > { %507 = vmatmul.bf16.vlgmr.msra.gmra.mxu2 %v425_v52 }
 0x1a6   : > { %v503_v54 = vpop.f32.mrf.mxu0 }
 0x1a7   : > { %v504_v55 = vadd.f32 %v698_v53, %v503_v54 }
 0x1a9   : > { %514 = vst.msk [vmem:[%s280_s9] sm:$0xff] %vm513_vm1, %v504_v55 }
 0x1ae   : > { %v505_v56 = vpop.f32.mrf.mxu0 }
 0x1af   : > { %v506_v57 = vadd.f32 %v698_v53, %v505_v56 }
 0x1b1   : > { %515 = vst.msk [vmem:[%s280_s9 + $0x8] sm:$0xff] %vm513_vm1, %v506_v57 }
 0x1c2   : > { %v508_v58 = vpop.f32.mrf.mxu2 }
 0x1c3   : > { %v509_v59 = vadd.f32 %v698_v53, %v508_v58 }
 0x1c5   : > { %516 = vst.msk [vmem:[%s280_s9 + $0x10] sm:$0xff] %vm513_vm1, %v509_v59 }
 0x1ca   : > { %v510_v60 = vpop.f32.mrf.mxu2 }
 0x1cb   : > { %v511_v61 = vadd.f32 %v698_v53, %v510_v60 }
 0x1cd   : > { %517 = vst.msk [vmem:[%s280_s9 + $0x18] sm:$0xff] %vm513_vm1, %v511_v61 }
 0x1ce PF: > { %s17_s24 = sadd.s32 1, %s705_s24  }
 0x1cf   : > { %p14_p4 = scmp.ge.s32.totalorder %s17_s24, 4  }
 0x1d1   :  { %16 = sbr.rel (!%p14_p4) target bundleno = 1 (0x1), region = 78 }

</bundles_post_ra>
